<compile_context>
chip_gen: v5e
topology: v5e:2x2
jax: 0.10.0
libtpu: 0.0.40
codegen_flags: <defaults>
</compile_context>

<pallas_src>
import math
import functools

import jax
import jax.numpy as jnp
from jax.experimental import pallas as pl
from jax.experimental.pallas import tpu as pltpu

LN_EPS = 1e-5  # PyTorch nn.LayerNorm default

_ROW_TILES = (512, 256, 128, 64, 32, 16, 8)   # descending: prefer big row tiles
_LANE_TILES = (512, 256, 128)
_KV_TILES = (512, 256, 128)

# Scoped-VMEM request: raises v5e's 16 MiB default; equals the v6e/v7x default.
_VMEM_LIMIT_BYTES = 32 * 1024 * 1024


def _round_up(x, m):
    return ((x + m - 1) // m) * m


def _pick_tile(dim, candidates):
    """Largest candidate (descending) that evenly divides `dim`, else full dim."""
    for c in candidates:
        if dim % c == 0:
            return c
    return dim


def _row_tiling(M):
    """(row_tile, padded_M).  Prefer >=128-row tiles; pad awkward M instead of
    falling back to a degenerate 8-row tile that re-streams the weights."""
    for c in _ROW_TILES:
        if M % c == 0 and (c >= 128 or c == M):
            return c, M
    if M <= 256:
        tm = _round_up(M, 8)
        return tm, tm
    return 256, _round_up(M, 256)


def _pad_rows(x2d, Mp):
    M = x2d.shape[0]
    if Mp == M:
        return x2d
    return jnp.pad(x2d, ((0, Mp - M), (0, 0)))


def _mosaic(semantics):
    return pltpu.CompilerParams(dimension_semantics=semantics,
                                vmem_limit_bytes=_VMEM_LIMIT_BYTES)


# ----------------------- fused LayerNorm + Linear kernel ----------------------
def _ln_matmul_kernel(x_ref, g_ref, bln_ref, w_ref, b_ref, o_ref, xn_ref):
    # LN is computed once per row tile (cached in VMEM as bf16) and reused for
    # every output-lane tile (the j axis is "arbitrary", so it runs innermost).
    @pl.when(pl.program_id(1) == 0)
    def _():
        x = x_ref[...].astype(jnp.float32)
        mean = jnp.mean(x, axis=-1, keepdims=True)
        xc = x - mean
        var = jnp.mean(xc * xc, axis=-1, keepdims=True)
        xn = xc * jax.lax.rsqrt(var + LN_EPS) * g_ref[...] + bln_ref[...]
        xn_ref[...] = xn.astype(jnp.bfloat16)

    y = jnp.dot(xn_ref[...], w_ref[...],
                preferred_element_type=jnp.float32) + b_ref[...]
    o_ref[...] = y.astype(o_ref.dtype)


def ln_matmul(x2d, gamma, beta, w, b, out_dtype=None):
    """y = LayerNorm(x) @ w + b  (bf16 MXU operands, f32 LN stats / accumulate)."""
    M, K = x2d.shape
    N = w.shape[1]
    out_dtype = out_dtype or x2d.dtype
    tm, Mp = _row_tiling(M)
    tn = _pick_tile(N, _LANE_TILES)
    xp = _pad_rows(x2d, Mp)
    # TODO(synk): tile K with an f32 accumulator for d_model too large for VMEM.
    out = pl.pallas_call(
        _ln_matmul_kernel,
        out_shape=jax.ShapeDtypeStruct((Mp, N), out_dtype),
        grid=(Mp // tm, N // tn),
        in_specs=[
            pl.BlockSpec((tm, K), lambda i, j: (i, 0)),
            pl.BlockSpec((1, K), lambda i, j: (0, 0)),
            pl.BlockSpec((1, K), lambda i, j: (0, 0)),
            pl.BlockSpec((K, tn), lambda i, j: (0, j)),
            pl.BlockSpec((1, tn), lambda i, j: (0, j)),
        ],
        out_specs=pl.BlockSpec((tm, tn), lambda i, j: (i, j)),
        scratch_shapes=[pltpu.VMEM((tm, K), jnp.bfloat16)],
        compiler_params=_mosaic(("parallel", "arbitrary")),
    )(xp, gamma.reshape(1, K), beta.reshape(1, K),
      w.astype(jnp.bfloat16), b.reshape(1, N))
    return out if Mp == M else out[:M]


# ------------------------------- Linear + bias ---------------------------------
def _matmul_bias_kernel(x_ref, w_ref, b_ref, o_ref):
    y = jnp.dot(x_ref[...].astype(jnp.bfloat16), w_ref[...],
                preferred_element_type=jnp.float32) + b_ref[...]
    o_ref[...] = y.astype(o_ref.dtype)


def matmul_bias(x2d, w, b, out_dtype=None):
    """y = x @ w + b, tiled over rows and output lanes (bf16 MXU operands)."""
    M, K = x2d.shape
    N = w.shape[1]
    out_dtype = out_dtype or x2d.dtype
    tm, Mp = _row_tiling(M)
    tn = _pick_tile(N, _LANE_TILES)
    xp = _pad_rows(x2d, Mp)
    out = pl.pallas_call(
        _matmul_bias_kernel,
        out_shape=jax.ShapeDtypeStruct((Mp, N), out_dtype),
        grid=(Mp // tm, N // tn),
        in_specs=[
            pl.BlockSpec((tm, K), lambda i, j: (i, 0)),
            pl.BlockSpec((K, tn), lambda i, j: (0, j)),
            pl.BlockSpec((1, tn), lambda i, j: (0, j)),
        ],
        out_specs=pl.BlockSpec((tm, tn), lambda i, j: (i, j)),
        compiler_params=_mosaic(("parallel", "parallel")),
    )(xp, w.astype(jnp.bfloat16), b.reshape(1, N))
    return out if Mp == M else out[:M]


# ------------- flash self-attention (online softmax over the key axis) --------
def _flash_attn_kernel(q_ref, k_ref, v_ref, mask_ref, wo_ref, bo_ref, res_ref,
                       o_ref, m_sc, l_sc, acc_sc, *, num_heads, scale):
    ki = pl.program_id(2)

    @pl.when(ki == 0)
    def _():
        m_sc[...] = jnp.full_like(m_sc, -1e30)
        l_sc[...] = jnp.zeros_like(l_sc)
        acc_sc[...] = jnp.zeros_like(acc_sc)

    # Upcast for the head split (validated relayout path), bf16 MXU operands.
    q = q_ref[0].astype(jnp.float32)
    k = k_ref[0].astype(jnp.float32)
    v = v_ref[0].astype(jnp.float32)
    tq, D = q.shape
    tk = k.shape[0]
    dk = D // num_heads

    qh = q.reshape(tq, num_heads, dk).astype(jnp.bfloat16)
    kh = k.reshape(tk, num_heads, dk).astype(jnp.bfloat16)
    vh = v.reshape(tk, num_heads, dk).astype(jnp.bfloat16)

    # scores[h, q, k]; scale applied post-dot so operands stay bf16, stats f32.
    s = jax.lax.dot_general(qh, kh, (((2,), (2,)), ((1,), (1,))),
                            preferred_element_type=jnp.float32) * scale
    mask = jnp.broadcast_to(mask_ref[0], (tq, tk))
    s = jnp.where(mask[None, :, :] == 0, -1e9, s)

    m_prev = m_sc[...]
    m_new = jnp.maximum(m_prev, jnp.max(s, axis=-1, keepdims=True))
    alpha = jnp.exp(m_prev - m_new)
    e = jnp.exp(s - m_new)
    l_sc[...] = alpha * l_sc[...] + jnp.sum(e, axis=-1, keepdims=True)
    acc_sc[...] = alpha * acc_sc[...] + jax.lax.dot_general(
        e.astype(jnp.bfloat16), vh, (((2,), (0,)), ((0,), (1,))),
        preferred_element_type=jnp.float32)
    m_sc[...] = m_new

    @pl.when(ki == pl.num_programs(2) - 1)
    def _():
        inv_l = pl.reciprocal(l_sc[...], approx=True)       # not on the probs path
        ctx = (acc_sc[...] * inv_l).astype(jnp.bfloat16)    # (H, tq, dk)
        # Fused output projection: per-head (tq,dk)@(dk,D) summed over heads,
        # so the final store into o_ref is lane-dense over D (no transpose).
        proj = jax.lax.dot_general(ctx, wo_ref[...],
                                   (((2,), (1,)), ((0,), (0,))),
                                   preferred_element_type=jnp.float32)  # (H,tq,D)
        out = jnp.sum(proj, axis=0) + bo_ref[...] + res_ref[0].astype(jnp.float32)
        o_ref[...] = out[None].astype(o_ref.dtype)


def flash_self_attention(qkv, mask, wo, bo, residual, *, d_model, num_heads):
    """out = residual + MHA(q, k, v) @ wo + bo, flash-tiled over the key axis.

    qkv:      (B, T, 3*d_model) bf16 (q | k | v along the lane axis)
    mask:     (1 or B, T or 1, T) int mask (0 => masked)
    residual: (B, T, d_model) f32
    """
    B, Tq, _ = qkv.shape
    Tk = Tq
    dk = d_model // num_heads
    scale = 1.0 / math.sqrt(dk)
    mask = mask.astype(jnp.int32)

    if d_model % 128 == 0:
        q_arr = k_arr = v_arr = qkv
        q_blk, k_blk, v_blk = 0, 1, 2
    else:
        q_arr = jax.lax.slice_in_dim(qkv, 0, d_model, axis=2)
        k_arr = jax.lax.slice_in_dim(qkv, d_model, 2 * d_model, axis=2)
        v_arr = jax.lax.slice_in_dim(qkv, 2 * d_model, 3 * d_model, axis=2)
        q_blk = k_blk = v_blk = 0

    # TODO(synk): pad/mask awkward Tq/Tk rather than falling back to full blocks.
    tq = _pick_tile(Tq, _ROW_TILES)
    tk = _pick_tile(Tk, _KV_TILES)
    grid = (B, Tq // tq, Tk // tk)

    Bm, Tm, _ = mask.shape
    mtb = tq if Tm != 1 else 1

    wo_r = wo.reshape(num_heads, dk, d_model).astype(jnp.bfloat16)

    return pl.pallas_call(
        functools.partial(_flash_attn_kernel, num_heads=num_heads, scale=scale),
        out_shape=jax.ShapeDtypeStruct((B, Tq, d_model), jnp.float32),
        grid=grid,
        in_specs=[
            pl.BlockSpec((1, tq, d_model), lambda b, qi, ki: (b, qi, q_blk)),
            pl.BlockSpec((1, tk, d_model), lambda b, qi, ki: (b, ki, k_blk)),
            pl.BlockSpec((1, tk, d_model), lambda b, qi, ki: (b, ki, v_blk)),
            pl.BlockSpec((1, mtb, tk),
                         lambda b, qi, ki: (b if Bm != 1 else 0,
                                            qi if Tm != 1 else 0, ki)),
            pl.BlockSpec((num_heads, dk, d_model), lambda b, qi, ki: (0, 0, 0)),
            pl.BlockSpec((1, d_model), lambda b, qi, ki: (0, 0)),
            pl.BlockSpec((1, tq, d_model), lambda b, qi, ki: (b, qi, 0)),
        ],
        out_specs=pl.BlockSpec((1, tq, d_model), lambda b, qi, ki: (b, qi, 0)),
        scratch_shapes=[pltpu.VMEM((num_heads, tq, 1), jnp.float32),
                        pltpu.VMEM((num_heads, tq, 1), jnp.float32),
                        pltpu.VMEM((num_heads, tq, dk), jnp.float32)],
        compiler_params=_mosaic(("parallel", "parallel", "arbitrary")),
    )(q_arr, k_arr, v_arr, mask, wo_r, bo.reshape(1, d_model), residual)


# ----------- source attention (returns probabilities) + fused out-proj --------
def _src_attn_kernel(q_ref, k_ref, v_ref, mask_ref, wo_ref, bo_ref, res_ref,
                     o_ref, p_ref, *, num_heads, scale):
    q = q_ref[0].astype(jnp.float32)
    k = k_ref[0].astype(jnp.float32)
    v = v_ref[0].astype(jnp.float32)
    tq, D = q.shape
    Tk = k.shape[0]
    dk = D // num_heads

    qh = q.reshape(tq, num_heads, dk).astype(jnp.bfloat16)
    kh = k.reshape(Tk, num_heads, dk).astype(jnp.bfloat16)
    vh = v.reshape(Tk, num_heads, dk).astype(jnp.bfloat16)

    s = jax.lax.dot_general(qh, kh, (((2,), (2,)), ((1,), (1,))),
                            preferred_element_type=jnp.float32) * scale
    mask = jnp.broadcast_to(mask_ref[0], (tq, Tk))
    s = jnp.where(mask[None, :, :] == 0, -1e9, s)

    m = jnp.max(s, axis=-1, keepdims=True)
    e = jnp.exp(s - m)
    denom = jnp.sum(e, axis=-1, keepdims=True)
    p = e * (1.0 / denom)                 # exact normalization: probs go to HBM
    p_ref[...] = p[None].astype(p_ref.dtype)

    ctx = jax.lax.dot_general(p.astype(jnp.bfloat16), vh,
                              (((2,), (0,)), ((0,), (1,))),
                              preferred_element_type=jnp.float32)   # (H, tq, dk)
    proj = jax.lax.dot_general(ctx.astype(jnp.bfloat16), wo_ref[...],
                               (((2,), (1,)), ((0,), (0,))),
                               preferred_element_type=jnp.float32)  # (H, tq, D)
    out = jnp.sum(proj, axis=0) + bo_ref[...] + res_ref[0].astype(jnp.float32)
    o_ref[...] = out[None].astype(o_ref.dtype)


def src_attention_with_probs(q, kv, mask, wo, bo, residual, *, d_model, num_heads):
    """out = residual + MHA(q, k, v) @ wo + bo; also returns attention probs
    (stored bf16 in HBM, upcast by the caller).

    K/V stay as one full-length block because the (B, H, Tq, Tk) probabilities
    must be materialized to HBM anyway.
    TODO(synk): two-pass flash tiling over Tk for very long encoder memories.
    """
    B, Tq, _ = q.shape
    Tk = kv.shape[1]
    dk = d_model // num_heads
    scale = 1.0 / math.sqrt(dk)
    mask = mask.astype(jnp.int32)

    if d_model % 128 == 0:
        k_arr = v_arr = kv
        k_blk, v_blk = 0, 1
    else:
        k_arr = jax.lax.slice_in_dim(kv, 0, d_model, axis=2)
        v_arr = jax.lax.slice_in_dim(kv, d_model, 2 * d_model, axis=2)
        k_blk = v_blk = 0

    tq = _pick_tile(Tq, _ROW_TILES)
    grid = (B, Tq // tq)

    Bm, Tm, _ = mask.shape
    mtb = tq if Tm != 1 else 1

    wo_r = wo.reshape(num_heads, dk, d_model).astype(jnp.bfloat16)

    out, probs = pl.pallas_call(
        functools.partial(_src_attn_kernel, num_heads=num_heads, scale=scale),
        out_shape=(jax.ShapeDtypeStruct((B, Tq, d_model), jnp.float32),
                   jax.ShapeDtypeStruct((B, num_heads, Tq, Tk), jnp.bfloat16)),
        grid=grid,
        in_specs=[
            pl.BlockSpec((1, tq, d_model), lambda b, qi: (b, qi, 0)),
            pl.BlockSpec((1, Tk, d_model), lambda b, qi: (b, 0, k_blk)),
            pl.BlockSpec((1, Tk, d_model), lambda b, qi: (b, 0, v_blk)),
            pl.BlockSpec((1, mtb, Tk),
                         lambda b, qi: (b if Bm != 1 else 0,
                                        qi if Tm != 1 else 0, 0)),
            pl.BlockSpec((num_heads, dk, d_model), lambda b, qi: (0, 0, 0)),
            pl.BlockSpec((1, d_model), lambda b, qi: (0, 0)),
            pl.BlockSpec((1, tq, d_model), lambda b, qi: (b, qi, 0)),
        ],
        out_specs=(pl.BlockSpec((1, tq, d_model), lambda b, qi: (b, qi, 0)),
                   pl.BlockSpec((1, num_heads, tq, Tk),
                                lambda b, qi: (b, 0, qi, 0))),
        compiler_params=_mosaic(("parallel", "parallel")),
    )(q, k_arr, v_arr, mask, wo_r, bo.reshape(1, d_model), residual)
    return out, probs


# -------------------- fused FFN: LN + w1 + relu + w2 + residual ---------------
def _ffn_kernel(x_ref, g_ref, bln_ref, w1_ref, b1_ref, w2_ref, b2_ref, o_ref,
                xn_ref, acc_ref):
    k = pl.program_id(1)

    @pl.when(k == 0)
    def _():
        x = x_ref[...].astype(jnp.float32)
        mean = jnp.mean(x, axis=-1, keepdims=True)
        xc = x - mean
        var = jnp.mean(xc * xc, axis=-1, keepdims=True)
        xn = xc * jax.lax.rsqrt(var + LN_EPS) * g_ref[...] + bln_ref[...]
        xn_ref[...] = xn.astype(jnp.bfloat16)
        acc_ref[...] = jnp.zeros_like(acc_ref)

    h = jnp.dot(xn_ref[...], w1_ref[...],
                preferred_element_type=jnp.float32) + b1_ref[...]
    h = jnp.maximum(h, 0.0).astype(jnp.bfloat16)
    acc_ref[...] += jnp.dot(h, w2_ref[...], preferred_element_type=jnp.float32)

    @pl.when(k == pl.num_programs(1) - 1)
    def _():
        out = x_ref[...].astype(jnp.float32) + acc_ref[...] + b2_ref[...]
        o_ref[...] = out.astype(o_ref.dtype)


def fused_ffn(x2d, gamma, beta, w1, b1, w2, b2):
    """out = x + relu(LN(x) @ w1 + b1) @ w2 + b2; the [rows, d_ff] hidden never
    touches HBM (d_ff tiled on an arbitrary axis into an f32 VMEM accumulator)."""
    M, D = x2d.shape
    DFF = w1.shape[1]
    tm, Mp = _row_tiling(M)
    tf = _pick_tile(DFF, _LANE_TILES)
    xp = _pad_rows(x2d, Mp)
    out = pl.pallas_call(
        _ffn_kernel,
        out_shape=jax.ShapeDtypeStruct((Mp, D), x2d.dtype),
        grid=(Mp // tm, DFF // tf),
        in_specs=[
            pl.BlockSpec((tm, D), lambda i, k: (i, 0)),
            pl.BlockSpec((1, D), lambda i, k: (0, 0)),
            pl.BlockSpec((1, D), lambda i, k: (0, 0)),
            pl.BlockSpec((D, tf), lambda i, k: (0, k)),
            pl.BlockSpec((1, tf), lambda i, k: (0, k)),
            pl.BlockSpec((tf, D), lambda i, k: (k, 0)),
            pl.BlockSpec((1, D), lambda i, k: (0, 0)),
        ],
        out_specs=pl.BlockSpec((tm, D), lambda i, k: (i, 0)),
        scratch_shapes=[pltpu.VMEM((tm, D), jnp.bfloat16),
                        pltpu.VMEM((tm, D), jnp.float32)],
        compiler_params=_mosaic(("parallel", "arbitrary")),
    )(xp, gamma.reshape(1, D), beta.reshape(1, D),
      w1.astype(jnp.bfloat16), b1.reshape(1, DFF),
      w2.astype(jnp.bfloat16), b2.reshape(1, D))
    return out if Mp == M else out[:M]


# ------------------------------- Decoder layer --------------------------------
def decoder_layer(x, memory, src_mask, tgt_mask, params):
    B, T, D = x.shape
    S = memory.shape[1]
    H = params["h"]
    sa, ca, ff = params["self_attn"], params["src_attn"], params["ff"]

    x2d = x.reshape(B * T, D)

    # ---- sublayer 0: self-attention (pre-norm; LN fused into QKV projection,
    #      output projection + residual fused into the flash attention kernel)
    qkv = ln_matmul(x2d, params["ln0_g"], params["ln0_b"],
                    sa["w_qkv"], sa["b_qkv"], out_dtype=jnp.bfloat16)
    qkv = qkv.reshape(B, T, 3 * D)
    x3d = flash_self_attention(qkv, tgt_mask, sa["wo"], sa["bo"], x,
                               d_model=D, num_heads=H)
    x2d = x3d.reshape(B * T, D)

    # ---- sublayer 1: source attention (Q from LN(x); K,V from raw memory)
    q = ln_matmul(x2d, params["ln1_g"], params["ln1_b"], ca["wq"], ca["bq"],
                  out_dtype=jnp.bfloat16).reshape(B, T, D)
    kv = matmul_bias(memory.reshape(B * S, D), ca["w_kv"], ca["b_kv"],
                     out_dtype=jnp.bfloat16).reshape(B, S, 2 * D)
    x3d, code_attn = src_attention_with_probs(q, kv, src_mask, ca["wo"], ca["bo"],
                                              x3d, d_model=D, num_heads=H)
    x2d = x3d.reshape(B * T, D)

    # ---- sublayer 2: fused feed-forward (LN + w1 + relu + w2 + residual)
    out2d = fused_ffn(x2d, params["ln2_g"], params["ln2_b"],
                      ff["w1"], ff["b1"], ff["w2"], ff["b2"])
    return out2d.reshape(B, T, D), code_attn.astype(jnp.float32)


# ----------------------------- Parameter init ---------------------------------
def _init_linear(key, din, dout):
    w = jax.random.normal(key, (din, dout), jnp.float32) * (1.0 / math.sqrt(din))
    b = jnp.zeros((dout,), jnp.float32)
    return w, b


def init_params(key, d_model, num_heads, d_ff):
    ks = jax.random.split(key, 8)

    # self-attention: combined QKV projection + output projection
    wq, bq = _init_linear(ks[0], d_model, d_model)
    wk, bk = _init_linear(ks[1], d_model, d_model)
    wv, bv = _init_linear(ks[2], d_model, d_model)
    wo, bo = _init_linear(ks[3], d_model, d_model)
    self_attn = dict(w_qkv=jnp.concatenate([wq, wk, wv], axis=1),
                     b_qkv=jnp.concatenate([bq, bk, bv], axis=0),
                     wo=wo, bo=bo)

    # source attention: separate Q (LN-fused) and combined KV (no LN) projections
    wq2, bq2 = _init_linear(ks[4], d_model, d_model)
    wk2, bk2 = _init_linear(ks[5], d_model, d_model)
    wv2, bv2 = _init_linear(ks[6], d_model, d_model)
    wo2, bo2 = _init_linear(ks[7], d_model, d_model)
    src_attn = dict(wq=wq2, bq=bq2,
                    w_kv=jnp.concatenate([wk2, wv2], axis=1),
                    b_kv=jnp.concatenate([bk2, bv2], axis=0),
                    wo=wo2, bo=bo2)

    kf1, kf2 = jax.random.split(ks[0], 2)
    w1, b1 = _init_linear(kf1, d_model, d_ff)
    w2, b2 = _init_linear(kf2, d_ff, d_model)

    return {
        "h": num_heads,
        "self_attn": self_attn,
        "src_attn": src_attn,
        "ff": dict(w1=w1, b1=b1, w2=w2, b2=b2),
        "ln0_g": jnp.ones((d_model,), jnp.float32),
        "ln0_b": jnp.zeros((d_model,), jnp.float32),
        "ln1_g": jnp.ones((d_model,), jnp.float32),
        "ln1_b": jnp.zeros((d_model,), jnp.float32),
        "ln2_g": jnp.ones((d_model,), jnp.float32),
        "ln2_b": jnp.zeros((d_model,), jnp.float32),
    }


# ------------------------------ pure-JAX reference -----------------------------
def _reference(x, memory, src_mask, tgt_mask, params):
    def ln(v, g, b):
        mu = jnp.mean(v, -1, keepdims=True)
        var = jnp.mean((v - mu) ** 2, -1, keepdims=True)
        return (v - mu) / jnp.sqrt(var + LN_EPS) * g + b

    def mha(q_in, kv_in, mask, wq, bq, wk, bk, wv, bv, wo, bo, h):
        B, Tq, D = q_in.shape
        Tk = kv_in.shape[1]
        dk = D // h
        q = (q_in @ wq + bq).reshape(B, Tq, h, dk).transpose(0, 2, 1, 3)
        k = (kv_in @ wk + bk).reshape(B, Tk, h, dk).transpose(0, 2, 1, 3)
        v = (kv_in @ wv + bv).reshape(B, Tk, h, dk).transpose(0, 2, 1, 3)
        s = jnp.einsum("bhqd,bhkd->bhqk", q, k) / math.sqrt(dk)
        s = jnp.where(mask[:, None] == 0, -1e9, s)
        p = jax.nn.softmax(s, axis=-1)
        ctx = jnp.einsum("bhqk,bhkd->bhqd", p, v).transpose(0, 2, 1, 3).reshape(B, Tq, D)
        return ctx @ wo + bo, p

    D = x.shape[-1]
    h = params["h"]
    sa, ca, ff = params["self_attn"], params["src_attn"], params["ff"]

    xn = ln(x, params["ln0_g"], params["ln0_b"])
    wq, wk, wv = sa["w_qkv"][:, :D], sa["w_qkv"][:, D:2 * D], sa["w_qkv"][:, 2 * D:]
    bq, bk, bv = sa["b_qkv"][:D], sa["b_qkv"][D:2 * D], sa["b_qkv"][2 * D:]
    o, _ = mha(xn, xn, tgt_mask, wq, bq, wk, bk, wv, bv, sa["wo"], sa["bo"], h)
    x = x + o

    xn = ln(x, params["ln1_g"], params["ln1_b"])
    wk2, wv2 = ca["w_kv"][:, :D], ca["w_kv"][:, D:]
    bk2, bv2 = ca["b_kv"][:D], ca["b_kv"][D:]
    o, attn = mha(xn, memory, src_mask, ca["wq"], ca["bq"], wk2, bk2, wv2, bv2,
                  ca["wo"], ca["bo"], h)
    x = x + o

    xn = ln(x, params["ln2_g"], params["ln2_b"])
    x = x + (jnp.maximum(xn @ ff["w1"] + ff["b1"], 0.0) @ ff["w2"] + ff["b2"])
    return x, attn


if __name__ == "__main__":
    # D chosen as a multiple of 128 so the combined QKV/KV lane-block indexing is
    # tile-aligned (matches real transformer dims); shapes otherwise small.
    B, T, S, D, H, DFF = 2, 8, 8, 128, 4, 256
    key = jax.random.PRNGKey(0)
    k_x, k_m, k_p = jax.random.split(key, 3)

    x = jax.random.normal(k_x, (B, T, D), jnp.float32)           # decoder input
    memory = jax.random.normal(k_m, (B, S, D), jnp.float32)      # encoder memory
    tgt_mask = jnp.tril(jnp.ones((1, T, T), jnp.int32))          # causal mask
    src_mask = jnp.ones((B, 1, S), jnp.int32)                    # no padding

    params = init_params(k_p, D, H, DFF)

    out, code_attn = decoder_layer(x, memory, src_mask, tgt_mask, params)
    jax.block_until_ready((out, code_attn))
    assert out.shape == (B, T, D)
    assert code_attn.shape == (B, H, T, S)

    # Correctness check against a pure-f32 JAX reference.  Tolerances reflect
    # bf16 MXU operands (with f32 accumulation) and bf16 storage of the
    # attention probabilities, as recommended in the performance review.
    ref_out, ref_attn = _reference(x, memory, src_mask, tgt_mask, params)
    ok_out = jnp.all(jnp.abs(out - ref_out) <= 2e-1 + 2e-2 * jnp.abs(ref_out))
    ok_att = jnp.all(jnp.abs(code_attn - ref_attn) <= 5e-2)
    assert bool(ok_out), "decoder output mismatch vs reference"
    assert bool(ok_att), "attention probs mismatch vs reference"

    print("KERNEL_OK")
</pallas_src>

<mosaic_0001>
module attributes {stable_mosaic.version = 11 : i64} {
  func.func @_ln_matmul_kernel(%arg0: i32, %arg1: i32, %arg2: memref<16x128xf32, #tpu.memory_space<vmem>>, %arg3: memref<1x128xf32, #tpu.memory_space<vmem>>, %arg4: memref<1x128xf32, #tpu.memory_space<vmem>>, %arg5: memref<128x128xbf16, #tpu.memory_space<vmem>>, %arg6: memref<1x128xf32, #tpu.memory_space<vmem>>, %arg7: memref<16x128xbf16, #tpu.memory_space<vmem>>, %arg8: memref<16x128xbf16, #tpu.memory_space<vmem>>) attributes {dimension_semantics = [#tpu.dimension_semantics<parallel>, #tpu.dimension_semantics<arbitrary>], iteration_bounds = array<i64: 1, 3>, scalar_prefetch = 0 : i64, scratch_operands = 1 : i64, tpu.core_type = #tpu.core_type<tc>, window_params = [{transform_indices = @transform_0, window_bounds = array<i64: 16, 128>}, {pipeline_mode = #tpu.pipeline_mode<synchronous>, transform_indices = @transform_1, window_bounds = array<i64: 1, 128>}, {pipeline_mode = #tpu.pipeline_mode<synchronous>, transform_indices = @transform_2, window_bounds = array<i64: 1, 128>}, {transform_indices = @transform_3, window_bounds = array<i64: 128, 128>}, {transform_indices = @transform_4, window_bounds = array<i64: 1, 128>}, {transform_indices = @transform_5, window_bounds = array<i64: 16, 128>}]} {
    %c0_i32 = arith.constant 0 : i32
    %0 = arith.cmpi eq, %arg1, %c0_i32 : i32
    %1 = arith.extui %0 : i1 to i32
    %c0_i32_0 = arith.constant 0 : i32
    %2 = arith.cmpi ne, %1, %c0_i32_0 : i32
    scf.if %2 {
      %c0_8 = arith.constant 0 : index
      %c0_9 = arith.constant 0 : index
      %11 = vector.load %arg2[%c0_8, %c0_9] : memref<16x128xf32, #tpu.memory_space<vmem>>, vector<16x128xf32>
      %cst_10 = arith.constant dense<0.000000e+00> : vector<16xf32>
      %12 = vector.multi_reduction <add>, %11, %cst_10 [1] : vector<16x128xf32> to vector<16xf32>
      %13 = vector.shape_cast %12 : vector<16xf32> to vector<16x1xf32>
      %cst_11 = arith.constant 1.280000e+02 : f32
      %14 = vector.broadcast %cst_11 : f32 to vector<16x1xf32>
      %15 = arith.divf %13, %14 : vector<16x1xf32>
      %16 = vector.broadcast %15 : vector<16x1xf32> to vector<16x128xf32>
      %17 = arith.subf %11, %16 : vector<16x128xf32>
      %18 = arith.mulf %17, %17 : vector<16x128xf32>
      %cst_12 = arith.constant dense<0.000000e+00> : vector<16xf32>
      %19 = vector.multi_reduction <add>, %18, %cst_12 [1] : vector<16x128xf32> to vector<16xf32>
      %20 = vector.shape_cast %19 : vector<16xf32> to vector<16x1xf32>
      %cst_13 = arith.constant 1.280000e+02 : f32
      %21 = vector.broadcast %cst_13 : f32 to vector<16x1xf32>
      %22 = arith.divf %20, %21 : vector<16x1xf32>
      %cst_14 = arith.constant 9.99999974E-6 : f32
      %23 = vector.broadcast %cst_14 : f32 to vector<16x1xf32>
      %24 = arith.addf %22, %23 : vector<16x1xf32>
      %25 = math.rsqrt %24 : vector<16x1xf32>
      %26 = vector.broadcast %25 : vector<16x1xf32> to vector<16x128xf32>
      %27 = arith.mulf %17, %26 : vector<16x128xf32>
      %c0_15 = arith.constant 0 : index
      %c0_16 = arith.constant 0 : index
      %28 = vector.load %arg3[%c0_15, %c0_16] : memref<1x128xf32, #tpu.memory_space<vmem>>, vector<1x128xf32>
      %29 = vector.broadcast %28 : vector<1x128xf32> to vector<16x128xf32>
      %30 = arith.mulf %27, %29 : vector<16x128xf32>
      %c0_17 = arith.constant 0 : index
      %c0_18 = arith.constant 0 : index
      %31 = vector.load %arg4[%c0_17, %c0_18] : memref<1x128xf32, #tpu.memory_space<vmem>>, vector<1x128xf32>
      %32 = vector.broadcast %31 : vector<1x128xf32> to vector<16x128xf32>
      %33 = arith.addf %30, %32 : vector<16x128xf32>
      %34 = arith.truncf %33 : vector<16x128xf32> to vector<16x128xbf16>
      %c0_19 = arith.constant 0 : index
      %c0_20 = arith.constant 0 : index
      %35 = vector.load %arg8[%c0_19, %c0_20] : memref<16x128xbf16, #tpu.memory_space<vmem>>, vector<16x128xbf16>
      tpu.vector_store %arg8[%c0_19, %c0_20], %34 {strides = array<i32>} : memref<16x128xbf16, #tpu.memory_space<vmem>>, vector<16x128xbf16>,
    } else {
    }
    %c0 = arith.constant 0 : index
    %c0_1 = arith.constant 0 : index
    %3 = vector.load %arg8[%c0, %c0_1] : memref<16x128xbf16, #tpu.memory_space<vmem>>, vector<16x128xbf16>
    %c0_2 = arith.constant 0 : index
    %c0_3 = arith.constant 0 : index
    %4 = vector.load %arg5[%c0_2, %c0_3] : memref<128x128xbf16, #tpu.memory_space<vmem>>, vector<128x128xbf16>
    %cst = arith.constant dense<0.000000e+00> : vector<16x128xf32>
    %5 = tpu.matmul %3, %4, %cst {dimension_numbers = #tpu.dot_dimension_numbers<[1], [0], [0], [1], [0, 0, 1, 1], [], []>} : vector<16x128xbf16>, vector<128x128xbf16>, vector<16x128xf32> -> vector<16x128xf32>
    %c0_4 = arith.constant 0 : index
    %c0_5 = arith.constant 0 : index
    %6 = vector.load %arg6[%c0_4, %c0_5] : memref<1x128xf32, #tpu.memory_space<vmem>>, vector<1x128xf32>
    %7 = vector.broadcast %6 : vector<1x128xf32> to vector<16x128xf32>
    %8 = arith.addf %5, %7 : vector<16x128xf32>
    %9 = arith.truncf %8 : vector<16x128xf32> to vector<16x128xbf16>
    %c0_6 = arith.constant 0 : index
    %c0_7 = arith.constant 0 : index
    %10 = vector.load %arg7[%c0_6, %c0_7] : memref<16x128xbf16, #tpu.memory_space<vmem>>, vector<16x128xbf16>
    tpu.vector_store %arg7[%c0_6, %c0_7], %9 {strides = array<i32>} : memref<16x128xbf16, #tpu.memory_space<vmem>>, vector<16x128xbf16>,
    return
  }
  func.func @transform_0(%arg0: i32, %arg1: i32) -> (i32, i32) {
    %c0_i32 = arith.constant 0 : i32
    %c0_i32_0 = arith.constant 0 : i32
    return %arg0, %c0_i32 : i32, i32
  }
  func.func @transform_1(%arg0: i32, %arg1: i32) -> (i32, i32) {
    %c0_i32 = arith.constant 0 : i32
    %c0_i32_0 = arith.constant 0 : i32
    %c0_i32_1 = arith.constant 0 : i32
    return %c0_i32, %c0_i32_0 : i32, i32
  }
  func.func @transform_2(%arg0: i32, %arg1: i32) -> (i32, i32) {
    %c0_i32 = arith.constant 0 : i32
    %c0_i32_0 = arith.constant 0 : i32
    %c0_i32_1 = arith.constant 0 : i32
    return %c0_i32, %c0_i32_0 : i32, i32
  }
  func.func @transform_3(%arg0: i32, %arg1: i32) -> (i32, i32) {
    %c0_i32 = arith.constant 0 : i32
    %c0_i32_0 = arith.constant 0 : i32
    return %c0_i32, %arg1 : i32, i32
  }
  func.func @transform_4(%arg0: i32, %arg1: i32) -> (i32, i32) {
    %c0_i32 = arith.constant 0 : i32
    %c0_i32_0 = arith.constant 0 : i32
    return %c0_i32, %arg1 : i32, i32
  }
  func.func @transform_5(%arg0: i32, %arg1: i32) -> (i32, i32) {
    %c0_i32 = arith.constant 0 : i32
    return %arg0, %arg1 : i32, i32
  }
}

</mosaic_0001>

<bundles_post_ra>
// kernel: tpu_custom_call.1
= control target key start
LH: loop header
LB: loop body
LE: loop exit
PB: predicated region body
PF: predicated region fallthrough
CT: control target
= control target key end

     0   :  { %s1272_s0 = inlined_call_operand.hbm [shape: f32[16,128], index: 0, kind: input, shape index: {}]   ;;  %s1273_s1 = inlined_call_operand.hbm [shape: f32[1,128], index: 1, kind: input, shape index: {}]   ;;  %s1274_s2 = inlined_call_operand.hbm [shape: f32[1,128], index: 2, kind: input, shape index: {}]   ;;  %s1275_s3 = inlined_call_operand.hbm [shape: bf16[128,384], index: 3, kind: input, shape index: {}]   ;;  %s1276_s4 = inlined_call_operand.vmem [shape: f32[1,384], index: 4, kind: input, shape index: {}]   ;;  %s1277_s5 = inlined_call_operand.hbm [shape: bf16[16,384], index: 5, kind: output, shape index: {}]  }
   0x1   :  { %1279 = sst [smem:[#allocation17_spill]] %s1272_s0 }
   0x2   :  { %1280 = sst [smem:[#allocation18_spill]] %s1273_s1 }
   0x3   :  { %1281 = sst [smem:[#allocation19_spill]] %s1274_s2 }
   0x4   :  { %10 = vsyncpa [#allocation4], 0 }
   0x5   :  { %11 = vsyncpa [#allocation7], 0 }
   0x6   :  { %12 = vsyncpa [#allocation10], 0 }
   0x7   :  { %14 = vsyncpa [#allocation10 + $0x1], 0 }
   0x8   :  { %15 = vsyncpa [#allocation5], 0 }
   0x9   :  { %17 = vsyncpa [#allocation5 + $0x1], 0  ;;  %s1074_s18 = smov 0   ;;  %s1076_s19 = smov 0  }
   0xa   :  { %s1078_s20 = smov 0   ;;  %s1080_s21 = smov 0  }
   0xb   :  { %s1082_s22 = smov 0   ;;  %s1084_s23 = smov 0  }
   0xc LB: > { %s634_s24 = sadd.s32 4294967295, %s1030_s23   ;;  %s635_s25 = sadd.s32 4294967294, %s1030_s23   ;;  %s1030_s23 = sphi %s1084_s23, %s23_s23   ;;  %s1026_s22 = sphi %s1082_s22, %s1300_s22   ;;  %s1022_s21 = sphi %s1080_s21, %s1299_s21   ;;  %s1018_s20 = sphi %s1078_s20, %s1298_s20   ;;  %s1014_s19 = sphi %s1076_s19, %s1297_s19   ;;  %s1010_s18 = sphi %s1074_s18, %s1296_s18  }
   0xd   : > { %p117_p0 = scmp.ne.s32.totalorder %s1018_s20, %s1014_s19  ;;  %p118_p1 = scmp.eq.s32.totalorder %s1030_s23, 0 }
   0xe   : > { %p123_p2 = scmp.ne.s32.totalorder %s1014_s19, %s1010_s18  ;;  %p1112_p3 = scmp.eq.s32.totalorder %s634_s24, 0 }
   0xf   : > { %p175_p4 = scmp.eq.s32.totalorder %s634_s24, 2  ;;  %p1116_p5 = por %p118_p1, %p117_p0 }
  0x10   : > { %p181_p6 = scmp.eq.s32.totalorder %s635_s25, 2  ;;  %p1122_p7 = por %p1112_p3, %p123_p2 }
  0x11   : > { %p1126_p8 = por %p175_p4, %p117_p0  ;;  %p636_p10 = scmp.ge.s32.totalorder %s1030_s23, 1 }
  0x12   : > { %p1130_p9 = por %p181_p6, %p123_p2  ;;  %p188_p11 = scmp.lt.s32.totalorder %s1030_s23, 4 }
  0x13   : > { %s1288_s1 = sld [smem:[#allocation18_spill]]  ;;  %s1032_s11 = smov [#allocation6]  }
  0x14   : > { %s1286_s6 = scalar_select %p1130_p9, 1, 0 }
  0x15   : > { %p1139_p12 = pnand %p636_p10, %p188_p11  ;;  %s219_s12 = sshll.u32 %s1032_s11, 4  ;;  %s220_s12 = int_to_ptr.vmem [resolvable:$true] %s219_s12 }
  0x16   : > { %1287 = sst [smem:[#allocation16_spill]] %s1286_s6  ;;  %p746_p0 = scmp.lt.s32.totalorder %s1030_s23, 3 }
  0x17   : > { %p725_p13 = pneg %p1139_p12  ;;  %s1292_s0 = sld [smem:[#allocation17_spill]] }
  0x18   : > { %p1154_p2 = pnand %p746_p0, %p1116_p5  ;;  %s1033_s24 = smov [#allocation3]  }
  0x19   : > { %s217_s9 = sshll.u32 %s1288_s1, 4  ;;  %p1148_p1 = pnand %p725_p13, %p1112_p3  ;;  %s218_s9 = int_to_ptr.hbm [resolvable:$true] %s217_s9 }
  0x1a   : > { %s204_s25 = sshll.u32 %s1033_s24, 4  ;;  %s1034_s28 = smov 128   ;;  %s205_s25 = int_to_ptr.vmem [resolvable:$true] %s204_s25 }
  0x1b   : > { %731 = dma.hbm_to_vmem [thread:$0]  (!%p1148_p1), %s218_s9, 16, %s220_s12, [#allocation7]  }
  0x1c   : > { %s1035_s7 = smov 8   ;;  %s1293_s2 = sld [smem:[#allocation19_spill]] }
  0x1d   : > { %s202_s17 = sshll.u32 %s1292_s0, 4  ;;  %s1036_s15 = smov [#allocation8]   ;;  %s203_s17 = int_to_ptr.hbm [resolvable:$true] %s202_s17 }
  0x1e   : > { %728 = dma.hbm_to_vmem [thread:$0]  (!%p1148_p1), %s203_s17, 256, %s205_s25, [#allocation4], %s1034_s28, %s1034_s28, %s1035_s7  }
  0x1f   : > { %s231_s16 = sshll.u32 %s1036_s15, 4  ;;  %s242_s9 = sand.u32 1, %s1018_s20   ;;  %s232_s16 = int_to_ptr.vmem [resolvable:$true] %s231_s16 }
  0x20   : > { %s32_s12 = sadd.s32 1, %s1026_s22  ;;  %s641_s24 = sshll.u32 %s242_s9, 6 }
  0x21   : > { %p33_p4 = scmp.ge.s32.totalorder %s32_s12, 3  ;;  %s642_s0 = sshll.u32 %s1026_s22, 2 }
  0x22   : > { %s229_s26 = sshll.u32 %s1293_s2, 4  ;;  %s250_s28 = scalar_lea.hbm %s1275_s3, %s642_s0  ;;  %s230_s26 = int_to_ptr.hbm [resolvable:$true] %s229_s26 }
  0x23   : > { %734 = dma.hbm_to_vmem [thread:$0]  (!%p1148_p1), %s230_s26, 16, %s232_s16, [#allocation7]  }
  0x24   : > { %s1302_s12 = smov (%p33_p4, %s32_s12), 0  ;;  %s246_s7 = scalar_lea.vmem [#allocation9], %s641_s24 }
  0x25   : > { %s253_s8 = sshll.u32 %s246_s7, 4  ;;  %s107_s11 = ssub.s32 %s1026_s22, %s1302_s12  ;;  %s254_s8 = int_to_ptr.vmem [resolvable:$true] %s253_s8 }
  0x26   : > { %s251_s13 = sshll.u32 %s250_s28, 4  ;;  %p108_p5 = scmp.eq.s32.totalorder %s107_s11, 0  ;;  %s252_s13 = int_to_ptr.hbm [resolvable:$true] %s251_s13 }
  0x27   : > { %s1294_s26 = sadd.s32 1, %s1018_s20  ;;  %s243_s16 = scalar_lea.sflag [#allocation10], %s242_s9 }
  0x28   : > { %s1183_s15 = scalar_select %p108_p5, %s1018_s20, %s1294_s26  }
  0x29   : > { %s1037_s1 = smov 192   ;;  %s1038_s2 = smov 64  }
  0x2a   : > { %s1039_s6 = smov 4   ;;  %271 = sbr.rel (%p1139_p12) target bundleno = 515 (0x203), region = 40 }
  0x2b   : > { %738 = dma.hbm_to_vmem [thread:$0]  (!%p1154_p2), %s252_s13, 1024, %s254_s8, %s243_s16, %s1037_s1, %s1038_s2, %s1039_s6  }
  0x2f   : > { %993 = dma.done.wait (%p1112_p3), [#allocation4], 256  }
  0x30   : > { %995 = vsyncadd (%p1112_p3), [#allocation4], 4294967040 }
  0x31   : > { %997 = dma.done.wait (%p1112_p3), [#allocation7], 32  }
  0x32   : > { %999 = vsyncadd (%p1112_p3), [#allocation7], 4294967264  ;;  %s1198_s0 = sand.u32 1, %s1014_s19  }
  0x33   : > { %s647_s1 = sshll.u32 %s1198_s0, 6  ;;  %s289_s2 = scalar_lea.sflag [#allocation10], %s1198_s0 }
  0x34   : > { %s1202_s6 = scalar_lea.vmem [#allocation9], %s647_s1 }
  0x35   : > { %1001 = dma.done.wait (%p1122_p7), %s289_s2, 1024  }
  0x36   : > { %1003 = vsyncadd (%p1122_p7), %s289_s2, 4294966272  ;;  %s648_s27 = sshll.u32 %s1198_s0, 3  ;;  %p324_p3 = scmp.lt.s32.totalorder %s1022_s21, 2 }
  0x37   : > { %s1217_s17 = scalar_lea.vmem [#allocation11], %s648_s27  ;;  %p649_p6 = scmp.ne.s32.totalorder %s1022_s21, 0 }
  0x38   : > { %s1211_s10 = scalar_select %p324_p3, %s1022_s21, 2 }
  0x39   : > { %331 = sbr.rel (%p649_p6) target bundleno = 340 (0x154), region = 60 }
  0x3a   : > { %s326_s24 = scalar_lea.vmem %s1276_s4, %s1211_s10 }
  0x3e   : > { %v332_v0 = vld [vmem:[#allocation3] sm:$0xff]  ;;  %v333_v1 = vld [vmem:[#allocation3 + $0x8] sm:$0xff]  ;;  %v1040_v2 = vmov 128.0   ;;  %v811_v35 = vld [vmem:[#allocation6] ss:$0 sm:$0xff] }
  0x3f   : > { %334 = vadd.xlane.f32.xlu0 %v332_v0  ;;  %813 = vrcp.f32 %v1040_v2  ;;  %v812_v39 = vld [vmem:[#allocation8] ss:$0 sm:$0xff] }
  0x45   : > { %v814_v3 = vpop.eup %813 }
  0x46   : > { %v339_v4 = vmul.f32 128.0, %v814_v3  ;;  %vm343_vm0 = vweird.f32 %v814_v3 }
  0x47   : > { %336 = vadd.xlane.f32.xlu0 %v333_v1 }
  0x48   : > { %v340_v5 = vsub.f32 1.0, %v339_v4 }
  0x4a   : > { %v341_v6 = vmul.f32 %v814_v3, %v340_v5 }
  0x4c   : > { %v342_v7 = vadd.f32 %v814_v3, %v341_v6 }
  0x4e   : > { %v344_v8 = vsel %vm343_vm0, %v814_v3, %v342_v7 }
  0xb2   : > { %v335_v9 = vpop.xlane.xlu0 %334 }
  0xb3   : > { %v345_v10 = vmul.f32 %v344_v8, %v335_v9 }
  0xb5   : > { %v347_v11 = vsub.f32 %v332_v0, %v345_v10 }
  0xb7   : > { %v349_v12 = vmul.f32 %v347_v11, %v347_v11 }
  0xb9   : > { %351 = vadd.xlane.f32.xlu1 %v349_v12 }
  0xba   : > { %v337_v13 = vpop.xlane.xlu0 %336 }
  0xbb   : > { %v346_v14 = vmul.f32 %v344_v8, %v337_v13 }
  0xbd   : > { %v348_v15 = vsub.f32 %v333_v1, %v346_v14 }
  0xbf   : > { %v350_v16 = vmul.f32 %v348_v15, %v348_v15 }
  0xc1   : > { %353 = vadd.xlane.f32.xlu1 %v350_v16 }
 0x12c   : > { %v352_v17 = vpop.xlane.xlu1 %351 }
 0x12d   : > { %v355_v18 = vmul.f32 %v352_v17, %v344_v8 }
 0x12f   : > { %v357_v19 = vadd.f32 1e-05, %v355_v18 }
 0x131   : > { %815 = vrsqrt.f32 %v357_v19  ;;  %vm365_vm2 = vweird.f32 %v357_v19 }
 0x134   : > { %v354_v20 = vpop.xlane.xlu1 %353 }
 0x135   : > { %v356_v21 = vmul.f32 %v354_v20, %v344_v8 }
 0x137   : > { %v816_v22 = vpop.eup %815  ;;  %v358_v23 = vadd.f32 1e-05, %v356_v21 }
 0x138   : > { %v360_v24 = vmul.f32 %v816_v22, %v357_v19  ;;  %vm366_vm1 = vweird.f32 %v816_v22 }
 0x139   : > { %817 = vrsqrt.f32 %v358_v23  ;;  %vm367_vm3 = vmor %vm365_vm2, %vm366_vm1  ;;  %vm375_vm5 = vweird.f32 %v358_v23 }
 0x13a   : > { %v361_v25 = vmul.f32 %v816_v22, %v360_v24 }
 0x13c   : > { %v362_v26 = vmul.f32 0.5, %v361_v25 }
 0x13e   : > { %v363_v27 = vsub.f32 1.5, %v362_v26 }
 0x13f   : > { %v818_v28 = vpop.eup %817 }
 0x140   : > { %v364_v29 = vmul.f32 %v816_v22, %v363_v27  ;;  %v370_v30 = vmul.f32 %v818_v28, %v358_v23  ;;  %vm376_vm4 = vweird.f32 %v818_v28 }
 0x141   : > { %vm377_vm6 = vmor %vm375_vm5, %vm376_vm4 }
 0x142   : > { %v371_v31 = vmul.f32 %v818_v28, %v370_v30  ;;  %v368_v32 = vsel %vm367_vm3, %v816_v22, %v364_v29 }
 0x143   : > { %v379_v36 = vmul.f32 %v368_v32, %v347_v11 }
 0x144   : > { %v372_v33 = vmul.f32 0.5, %v371_v31 }
 0x145   : > { %v385_v40 = vmul.f32 %v811_v35, %v379_v36 }
 0x146   : > { %v373_v34 = vsub.f32 1.5, %v372_v33 }
 0x147   : > { %v391_v43 = vadd.f32 %v812_v39, %v385_v40 }
 0x148   : > { %v374_v37 = vmul.f32 %v818_v28, %v373_v34 }
 0x14a   : > { %v378_v38 = vsel %vm377_vm6, %v818_v28, %v374_v37 }
 0x14b   : > { %v380_v41 = vmul.f32 %v378_v38, %v348_v15 }
 0x14d   : > { %v386_v42 = vmul.f32 %v811_v35, %v380_v41 }
 0x14f   : > { %v392_v44 = vadd.f32 %v812_v39, %v386_v42 }
 0x151   : > { %v702_v45 = vpack.c.bf16 %v392_v44, %v391_v43 }
 0x153   : > { %703 = vst [vmem:[#allocation2] sm:$0xff] %v702_v45  }
 0x154 PF: > { %v698_v46 = vld [vmem:[%s1202_s6 + $0x38] sm:$0xff]  ;;  %v697_v47 = vld [vmem:[%s1202_s6 + $0x30] sm:$0xff]  ;;  %v696_v48 = vld [vmem:[%s1202_s6 + $0x28] sm:$0xff]  ;;  %s687_s29 = sshll.u32 %s1022_s21, 2  ;;  %s506_s13 = sshll.u32 %s1217_s17, 4  ;;  %s507_s13 = int_to_ptr.vmem [resolvable:$true] %s506_s13 }
 0x155   : > { %473 = vmatpush.bf16.msra.mxu0 %v698_v46  ;;  %v695_v49 = vld [vmem:[%s1202_s6 + $0x20] sm:$0xff]  ;;  %v694_v50 = vld [vmem:[%s1202_s6 + $0x18] sm:$0xff]  ;;  %v693_v51 = vld [vmem:[%s1202_s6 + $0x10] sm:$0xff]  ;;  %s505_s7 = scalar_lea.hbm %s1277_s5, %s687_s29  ;;  %s492_s21 = scalar_lea.sflag [#allocation5], %s1198_s0 }
 0x156   : > { %v692_v52 = vld [vmem:[%s1202_s6 + $0x8] sm:$0xff]  ;;  %v691_v53 = vld [vmem:[%s1202_s6] sm:$0xff]  ;;  %s508_s26 = sshll.u32 %s505_s7, 4  ;;  %s960_s27 = scalar_lea.hbm %s1277_s5, 24  ;;  %s509_s26 = int_to_ptr.hbm [resolvable:$true] %s508_s26 }
 0x157   : > { %v819_v56 = vld [vmem:[%s326_s24] ss:$0 sm:$0xff]  ;;  %s954_s16 = sshra.s32 %s509_s26, 4  ;;  %s955_s16 = int_to_ptr.hbm [resolvable:$true] %s954_s16 }
 0x158   : > { %s956_s1 = scalar_lea.hbm %s955_s16, 8  ;;  %p961_p12 = scmp.lt.s32.totalorder %s955_s16, %s1277_s5 }
 0x159   : > { %474 = vmatpush.bf16.msra.mxu0 %v697_v47  ;;  %p957_p7 = scmp.ne.s32.totalorder %s955_s16, %s956_s1  ;;  %p962_p13 = scmp.lt.s32.totalorder %s960_s27, %s956_s1 }
 0x15a   : > { %v690_v54 = vld [vmem:[#allocation2] sm:$0xff] }
 0x15b   : > { %p958_p10 = pnand %p957_p7, %p1126_p8  ;;  %p963_p0 = por %p962_p13, %p961_p12 }
 0x15d   : > { %475 = vmatpush.bf16.msra.mxu0 %v696_v48  ;;  %p959_p11 = pneg %p958_p10 }
 0x15f   : > { %p964_p1 = pnand %p963_p0, %p959_p11 }
 0x161   : > { %476 = vmatpush.bf16.msra.mxu0 %v695_v49 }
 0x165   : > { %477 = vmatpush.bf16.msra.mxu0 %v694_v50 }
 0x169   : > { %478 = vmatpush.bf16.msra.mxu0 %v693_v51 }
 0x16d   : > { %479 = vmatpush.bf16.msra.mxu0 %v692_v52 }
 0x171   : > { %480 = vmatpush.bf16.msra.mxu0 %v691_v53 }
 0x174   : > { %481 = vmatmul.bf16.vlgmr.msra.gmra.mxu0 %v690_v54 }
 0x1f1   : > { %v482_v55 = vpop.f32.mrf.mxu0 }
 0x1f2   : > { %v483_v58 = vadd.f32 %v819_v56, %v482_v55 }
 0x1f9   : > { %v484_v57 = vpop.f32.mrf.mxu0 }
 0x1fa   : > { %v485_v59 = vadd.f32 %v819_v56, %v484_v57 }
 0x1fc   : > { %v707_v60 = vpack.c.bf16 %v485_v59, %v483_v58 }
 0x1fe   : > { %708 = vst [vmem:[%s1217_s17] sm:$0xff] %v707_v60  }
 0x1ff   : > { %967 = shalt.err (!%p964_p1)
}
 0x200   : > { %s1041_s0 = smov 64   ;;  %s1042_s9 = smov 192  }
 0x201   : > { %s1043_s24 = smov 4  }
 0x202   : > { %723 = dma.vmem_to_hbm [thread:$0]  (%p1126_p8), %s507_s13, 128, %s509_s26, %s492_s21, %s1041_s0, %s1042_s9, %s1043_s24  }
 0x203 PF: > { %p750_p2 = scmp.ge.s32.totalorder %s1030_s23, 2  ;;  %s523_s29 = sand.u32 1, %s1010_s18  }
 0x204   : > { %s524_s25 = scalar_lea.sflag [#allocation5], %s523_s29 }
 0x205   : > { %p740_p4 = pnand %p750_p2, %p1130_p9 }
 0x207   : > { %p741_p5 = pneg %p740_p4 }
 0x209   : > { %1005 = dma.done.wait (%p741_p5), %s524_s25, 128  }
 0x20a   : > { %1007 = vsyncadd (%p741_p5), %s524_s25, 4294967168  ;;  %s23_s23 = sadd.s32 1, %s1030_s23   ;;  %s1296_s18 = smov %s1014_s19 }
 0x20b   : > { %p20_p3 = scmp.ge.s32.totalorder %s23_s23, 5   ;;  %s1297_s19 = smov %s1018_s20 }
 0x20c   : > { %s1298_s20 = smov %s1183_s15  ;;  %s1299_s21 = smov %s1026_s22 }
 0x20d   : > { %s1300_s22 = smov %s1302_s12  ;;  %22 = sbr.rel (!%p20_p3) target bundleno = 12 (0xc), region = 106 }
 0x212   :  { %530 = vsyncpa [#allocation4], 1 }
 0x213   :  { %532 = vsyncpa [#allocation4 + $0x1], 1 }
 0x214   :  { %533 = vsyncpa [#allocation7], 1 }
 0x215   :  { %534 = vsyncpa [#allocation10], 1 }
 0x216   :  { %536 = vsyncpa [#allocation10 + $0x1], 1 }
 0x217   :  { %537 = vsyncpa [#allocation5], 1 }
 0x218   :  { %539 = vsyncpa [#allocation5 + $0x1], 1 }

</bundles_post_ra>
